<compile_context>
chip_gen: v7x
topology: tpu7x:2x2x1
jax: 0.10.0
libtpu: 0.0.40
codegen_flags: <defaults>
</compile_context>

<pallas_src>
import jax
import jax.numpy as jnp
from jax import lax
from jax.experimental import pallas as pl
from jax.experimental.pallas import tpu as pltpu


# ----------------------------------------------------------------------------
# Helpers
# ----------------------------------------------------------------------------
def _compiler_params(*semantics, vmem_mb=64):
    return pltpu.CompilerParams(
        dimension_semantics=tuple(semantics),
        vmem_limit_bytes=vmem_mb * 1024 * 1024,
    )


def _pick_tile(total, pref):
    """Largest tile <= pref that divides `total` and is a multiple of 8
    (or `total` itself when small / no suitable divisor exists)."""
    if total <= pref:
        return total
    start = pref - (pref % 8)
    for t in range(start, 7, -8):
        if total % t == 0:
            return t
    return total


# ----------------------------------------------------------------------------
# Kernel 1: fused (src+pos) add + [offset | attn-logit] projection (single
# concatenated weight, single lane-dense output block) + value projection.
# ----------------------------------------------------------------------------
def _samp_proj_kernel(src_ref, pos_ref, ws_ref, bs_ref, wv_ref, bv_ref,
                      samp_ref, val_ref):
    src = src_ref[...]
    q = (src + pos_ref[...]).astype(jnp.bfloat16)              # with_pos_embed, fused
    samp_ref[...] = (jnp.dot(q, ws_ref[...], preferred_element_type=jnp.float32)
                     + bs_ref[...])
    val_ref[...] = (
        jnp.dot(src.astype(jnp.bfloat16), wv_ref[...],
                preferred_element_type=jnp.float32) + bv_ref[...]
    ).astype(jnp.bfloat16)


def sampling_projections(src2d, pos2d, w_samp, b_samp, w_val, b_val, row_tile):
    M, D = src2d.shape
    n_samp = w_samp.shape[1]
    row = lambda n: pl.BlockSpec((row_tile, n), lambda i: (i, 0))
    full = lambda a: pl.BlockSpec(a.shape, lambda i: (0, 0))
    return pl.pallas_call(
        _samp_proj_kernel,
        out_shape=(
            jax.ShapeDtypeStruct((M, n_samp), jnp.float32),
            jax.ShapeDtypeStruct((M, D), jnp.bfloat16),
        ),
        grid=(M // row_tile,),
        in_specs=[row(D), row(D), full(w_samp), full(b_samp),
                  full(w_val), full(b_val)],
        out_specs=(row(n_samp), row(D)),
        compiler_params=_compiler_params("parallel"),
    )(src2d, pos2d, w_samp, b_samp, w_val, b_val)


# ----------------------------------------------------------------------------
# Kernel 3 (fused): output projection + residual + LayerNorm1 + FFN +
# residual + LayerNorm2 — the whole post-attention tail in one HBM pass.
# ----------------------------------------------------------------------------
def _post_attn_kernel(attn_ref, res_ref, wo_ref, bo_ref, g1_ref, be1_ref,
                      w1_ref, b1_ref, w2_ref, b2_ref, g2_ref, be2_ref, o_ref):
    y = jnp.dot(attn_ref[...], wo_ref[...],
                preferred_element_type=jnp.float32) + bo_ref[...]
    z = res_ref[...] + y                                        # residual (dropout = id)
    mean = jnp.mean(z, axis=-1, keepdims=True)
    var = jnp.mean(jnp.square(z - mean), axis=-1, keepdims=True)
    x = (z - mean) * lax.rsqrt(var + 1e-5) * g1_ref[...] + be1_ref[...]

    h = jnp.dot(x.astype(jnp.bfloat16), w1_ref[...],
                preferred_element_type=jnp.float32) + b1_ref[...]
    h = jnp.maximum(h, 0.0).astype(jnp.bfloat16)                # relu (module default)
    y2 = jnp.dot(h, w2_ref[...], preferred_element_type=jnp.float32) + b2_ref[...]
    z2 = x + y2                                                 # residual (dropout = id)
    mean2 = jnp.mean(z2, axis=-1, keepdims=True)
    var2 = jnp.mean(jnp.square(z2 - mean2), axis=-1, keepdims=True)
    o_ref[...] = (z2 - mean2) * lax.rsqrt(var2 + 1e-5) * g2_ref[...] + be2_ref[...]


def post_attention_block(attn2d, res2d, p, row_tile):
    M, D = res2d.shape
    row = lambda n: pl.BlockSpec((row_tile, n), lambda i: (i, 0))
    full = lambda a: pl.BlockSpec(a.shape, lambda i: (0, 0))
    args = (attn2d, res2d, p["w_out"], p["b_out"], p["ln1_g"], p["ln1_b"],
            p["w1"], p["b1"], p["w2"], p["b2"], p["ln2_g"], p["ln2_b"])
    in_specs = [row(D), row(D)] + [full(a) for a in args[2:]]
    return pl.pallas_call(
        _post_attn_kernel,
        out_shape=jax.ShapeDtypeStruct((M, D), jnp.float32),
        grid=(M // row_tile,),
        in_specs=in_specs,
        out_specs=row(D),
        compiler_params=_compiler_params("parallel"),
    )(*args)


# ----------------------------------------------------------------------------
# Kernel 2: multi-scale deformable attention core (grid over batch x q-tiles).
# Sampling-location math is done in the kernel prologue from the fused
# projection output plus a pre-scaled reference-point tile.
# ----------------------------------------------------------------------------
_HW_CHUNK = 1024   # cap on pixel-axis tile (bounds the (q_tile, hw) temporaries)


def make_deform_attn(spatial_shapes, n_batch, len_q, n_heads, d_head,
                     n_levels, n_points, q_tile):
    level_starts, s = [], 0
    for (H_, W_) in spatial_shapes:
        level_starts.append(s)
        s += H_ * W_
    len_in = s
    d_model = n_heads * d_head
    LP = n_levels * n_points
    hlp = n_heads * LP
    off_w = 2 * hlp

    def kernel(*refs):
        seg_ref = refs[0]
        cx_refs = refs[1:1 + n_levels]
        cy_refs = refs[1 + n_levels:1 + 2 * n_levels]
        val_ref, samp_ref, refpt_ref, o_ref = refs[1 + 2 * n_levels:]

        samp = samp_ref[0]                    # (q_tile, 3*hlp) f32
        offs = samp[:, :off_w]                # sampling offsets, (q_tile, 2*hlp)
        logits = samp[:, off_w:]              # attention logits, (q_tile, hlp)
        refp = refpt_ref[0]                   # (q_tile, 2*n_levels): ref*WH - 0.5

        # Full-width per-head softmax: subtracting the global row max is valid
        # for a per-head softmax; one exp pass over all hlp lanes, per-head
        # denominators via a block-diagonal 0/1 segment matrix on the MXU.
        m = jnp.max(logits, axis=-1, keepdims=True)
        e = jnp.exp(logits - m)
        denom = jnp.dot(e, seg_ref[...], preferred_element_type=jnp.float32)
        aw = e * pl.reciprocal(denom, approx=True)

        # Pixel-center coordinates, pre-split per level (lane-aligned loads).
        cx_l_all = [r[...] for r in cx_refs]                   # (1, hw_l)
        cy_l_all = [r[...] for r in cy_refs]
        rx_l = [refp[:, 2 * l:2 * l + 1] for l in range(n_levels)]
        ry_l = [refp[:, 2 * l + 1:2 * l + 2] for l in range(n_levels)]

        out_heads = []
        for h in range(n_heads):
            out_h = jnp.zeros((q_tile, d_head), jnp.float32)
            for l, (H_, W_) in enumerate(spatial_shapes):
                hw = H_ * W_
                st = level_starts[l]
                # grid_sample pixel coordinates (align_corners=False):
                #   px = loc_x*W - 0.5 = ref_x*W - 0.5 + off_x   (ref pre-scaled)
                pts = []
                for p in range(n_points):
                    jo = 2 * ((h * n_levels + l) * n_points + p)
                    ja = h * LP + l * n_points + p
                    px = offs[:, jo:jo + 1] + rx_l[l]           # (q_tile, 1)
                    py = offs[:, jo + 1:jo + 2] + ry_l[l]
                    pts.append((aw[:, ja:ja + 1], px, py))
                # Bilinear grid_sample (zeros padding) as separable hat weights
                #   w(c) = relu(1-|px-cx|) * relu(1-|py-cy|)
                # over the level's pixels, chunked along the pixel axis; each
                # chunk is contracted against the value slab on the MXU.
                for c0 in range(0, hw, _HW_CHUNK):
                    c1 = min(c0 + _HW_CHUNK, hw)
                    cxc = cx_l_all[l][:, c0:c1]                 # (1, chunk)
                    cyc = cy_l_all[l][:, c0:c1]
                    m_c = jnp.zeros((q_tile, c1 - c0), jnp.float32)
                    for (aw_j, px, py) in pts:
                        wx = jnp.maximum(1.0 - jnp.abs(px - cxc), 0.0)
                        wy = jnp.maximum(1.0 - jnp.abs(py - cyc), 0.0)
                        m_c = m_c + aw_j * wx * wy
                    v_c = val_ref[0, st + c0:st + c1, h * d_head:(h + 1) * d_head]
                    out_h = out_h + jnp.dot(m_c.astype(jnp.bfloat16), v_c,
                                            preferred_element_type=jnp.float32)
            out_heads.append(out_h)
        # single lane-dense store, bf16 (consumer is a bf16 MXU operand)
        o_ref[0, :, :] = jnp.concatenate(out_heads, axis=-1).astype(o_ref.dtype)

    n_q_tiles = len_q // q_tile
    in_specs = (
        [pl.BlockSpec((hlp, hlp), lambda b, q: (0, 0))]                         # seg
        + [pl.BlockSpec((1, H_ * W_), lambda b, q: (0, 0))
           for (H_, W_) in spatial_shapes]                                      # cx per level
        + [pl.BlockSpec((1, H_ * W_), lambda b, q: (0, 0))
           for (H_, W_) in spatial_shapes]                                      # cy per level
        + [pl.BlockSpec((1, len_in, d_model), lambda b, q: (b, 0, 0)),          # value (bf16)
           pl.BlockSpec((1, q_tile, 3 * hlp), lambda b, q: (b, q, 0)),          # samp proj
           pl.BlockSpec((1, q_tile, 2 * n_levels), lambda b, q: (b, q, 0))]     # ref pts
    )
    return pl.pallas_call(
        kernel,
        out_shape=jax.ShapeDtypeStruct((n_batch, len_q, d_model), jnp.bfloat16),
        grid=(n_batch, n_q_tiles),
        in_specs=in_specs,
        out_specs=pl.BlockSpec((1, q_tile, d_model), lambda b, q: (b, q, 0)),
        compiler_params=_compiler_params("parallel", "parallel", vmem_mb=48),
    )


# ----------------------------------------------------------------------------
# Glue: reference points (same math as the PyTorch staticmethod).
# ----------------------------------------------------------------------------
def get_reference_points(spatial_shapes, valid_ratios):
    ref_list = []
    for lvl, (H_, W_) in enumerate(spatial_shapes):
        ref_y, ref_x = jnp.meshgrid(
            jnp.linspace(0.5, H_ - 0.5, H_, dtype=jnp.float32),
            jnp.linspace(0.5, W_ - 0.5, W_, dtype=jnp.float32),
            indexing="ij",
        )
        ref_y = ref_y.reshape(-1)[None] / (valid_ratios[:, None, lvl, 1] * H_)
        ref_x = ref_x.reshape(-1)[None] / (valid_ratios[:, None, lvl, 0] * W_)
        ref_list.append(jnp.stack((ref_x, ref_y), -1))
    reference_points = jnp.concatenate(ref_list, 1)                  # (N, Len, 2)
    reference_points = reference_points[:, :, None] * valid_ratios[:, None]
    return reference_points                                          # (N, Len, L, 2)


# ----------------------------------------------------------------------------
# Encoder forward (num_layers cloned layers).
# ----------------------------------------------------------------------------
def deformable_encoder_forward(src, pos, spatial_shapes, valid_ratios,
                               layer_params, n_heads, n_points):
    N, Lq, D = src.shape
    n_levels = len(spatial_shapes)
    d_head = D // n_heads
    LP = n_levels * n_points
    hlp = n_heads * LP
    M = N * Lq

    # Reference points, computed once per forward and pre-scaled to
    # grid_sample pixel coordinates: px = ref_x*W - 0.5 + off_x.
    ref_pts = get_reference_points(spatial_shapes, valid_ratios)     # (N, Lq, L, 2)
    wh = jnp.array([[W_, H_] for (H_, W_) in spatial_shapes], jnp.float32)
    ref_scaled = (ref_pts * wh[None, None] - 0.5).reshape(N, Lq, 2 * n_levels)

    # Host-precomputed pixel-center coordinates, one small vector per level.
    cx_list, cy_list = [], []
    for (H_, W_) in spatial_shapes:
        yy, xx = jnp.meshgrid(jnp.arange(H_, dtype=jnp.float32),
                              jnp.arange(W_, dtype=jnp.float32), indexing="ij")
        cx_list.append(xx.reshape(1, -1))
        cy_list.append(yy.reshape(1, -1))

    # Per-head softmax segment matrix (block-diagonal 0/1), built once.
    seg = jnp.kron(jnp.eye(n_heads, dtype=jnp.float32),
                   jnp.ones((LP, LP), jnp.float32))                  # (hlp, hlp)

    q_tile = _pick_tile(Lq, 256)
    row_tile = _pick_tile(M, 512)
    deform_call = make_deform_attn(spatial_shapes, N, Lq, n_heads, d_head,
                                   n_levels, n_points, q_tile)

    pos2d = pos.reshape(M, D)
    out = src
    for p in layer_params:
        src2d = out.reshape(M, D)

        # fused: (src+pos) @ [W_off | W_attn]   and   src @ W_val
        samp2d, val2d = sampling_projections(
            src2d, pos2d, p["w_samp"], p["b_samp"], p["w_val"], p["b_val"], row_tile)
        # TODO(synk): padding_mask is None in this run; masked_fill of value is skipped.

        attn = deform_call(seg, *cx_list, *cy_list,
                           val2d.reshape(N, Lq, D),
                           samp2d.reshape(N, Lq, 3 * hlp),
                           ref_scaled)                               # (N, Lq, D) bf16

        # fused: out_proj + residual + LN1 + FFN + residual + LN2
        x = post_attention_block(attn.reshape(M, D), src2d, p, row_tile)
        out = x.reshape(N, Lq, D)
    return out


# ----------------------------------------------------------------------------
# Deterministic parameter construction (shapes from the module __init__).
# Matmul weights are stored in bf16 (MXU-friendly); biases/LN params stay f32.
# ----------------------------------------------------------------------------
def init_layer_params(key, d_model, d_ffn, n_heads, n_levels, n_points):
    ks = jax.random.split(key, 6)
    hlp = n_heads * n_levels * n_points

    def w(k, shape, scale):
        return jax.random.normal(k, shape, jnp.float32) * scale

    w_off = w(ks[0], (d_model, hlp * 2), 0.02)
    w_attn = w(ks[1], (d_model, hlp), 0.02)
    return dict(
        # fused sampling projection: columns = [offsets (2*hlp) | attn logits (hlp)]
        w_samp=jnp.concatenate([w_off, w_attn], axis=1).astype(jnp.bfloat16),
        b_samp=jnp.zeros((1, hlp * 3), jnp.float32),
        w_val=w(ks[2], (d_model, d_model), 0.05).astype(jnp.bfloat16),
        b_val=jnp.zeros((1, d_model), jnp.float32),
        w_out=w(ks[3], (d_model, d_model), 0.05).astype(jnp.bfloat16),
        b_out=jnp.zeros((1, d_model), jnp.float32),
        ln1_g=jnp.ones((1, d_model), jnp.float32),
        ln1_b=jnp.zeros((1, d_model), jnp.float32),
        w1=w(ks[4], (d_model, d_ffn), 0.05).astype(jnp.bfloat16),
        b1=jnp.zeros((1, d_ffn), jnp.float32),
        w2=w(ks[5], (d_ffn, d_model), 0.05).astype(jnp.bfloat16),
        b2=jnp.zeros((1, d_model), jnp.float32),
        ln2_g=jnp.ones((1, d_model), jnp.float32),
        ln2_b=jnp.zeros((1, d_model), jnp.float32),
    )


if __name__ == "__main__":
    key = jax.random.PRNGKey(0)

    # small config
    N = 2
    d_model = 32
    d_ffn = 64
    n_heads = 4
    n_points = 2
    num_layers = 2
    spatial_shapes = ((8, 8), (4, 4))             # two feature levels
    n_levels = len(spatial_shapes)
    Len = sum(h * w for h, w in spatial_shapes)   # 80

    k_src, k_pos, k_vr, k_p = jax.random.split(key, 4)
    src = jax.random.normal(k_src, (N, Len, d_model), jnp.float32)
    pos = jax.random.normal(k_pos, (N, Len, d_model), jnp.float32)
    # valid ratios in (0.5, 1.0], deterministic
    valid_ratios = 0.5 + 0.5 * jax.random.uniform(k_vr, (N, n_levels, 2), jnp.float32)
    level_start_index = jnp.array([0, spatial_shapes[0][0] * spatial_shapes[0][1]],
                                  jnp.int32)  # kept for fidelity; starts are static in-kernel

    layer_keys = jax.random.split(k_p, num_layers)
    layer_params = [
        init_layer_params(lk, d_model, d_ffn, n_heads, n_levels, n_points)
        for lk in layer_keys
    ]

    out = deformable_encoder_forward(src, pos, spatial_shapes, valid_ratios,
                                     layer_params, n_heads, n_points)
    out = jax.block_until_ready(out)

    assert out.shape == (N, Len, d_model), out.shape
    assert bool(jnp.all(jnp.isfinite(out)))
    print("KERNEL_OK")
</pallas_src>

<mosaic_0001>
module attributes {stable_mosaic.version = 11 : i64} {
  func.func @_samp_proj_kernel(%arg0: i32, %arg1: memref<160x32xf32, #tpu.memory_space<vmem>>, %arg2: memref<160x32xf32, #tpu.memory_space<vmem>>, %arg3: memref<32x48xbf16, #tpu.memory_space<vmem>>, %arg4: memref<1x48xf32, #tpu.memory_space<vmem>>, %arg5: memref<32x32xbf16, #tpu.memory_space<vmem>>, %arg6: memref<1x32xf32, #tpu.memory_space<vmem>>, %arg7: memref<160x48xf32, #tpu.memory_space<vmem>>, %arg8: memref<160x32xbf16, #tpu.memory_space<vmem>>) attributes {dimension_semantics = [#tpu.dimension_semantics<parallel>], iteration_bounds = array<i64: 1>, scalar_prefetch = 0 : i64, scratch_operands = 0 : i64, tpu.core_type = #tpu.core_type<tc>, window_params = [{transform_indices = @transform_0, window_bounds = array<i64: 160, 32>}, {transform_indices = @transform_1, window_bounds = array<i64: 160, 32>}, {pipeline_mode = #tpu.pipeline_mode<synchronous>, transform_indices = @transform_2, window_bounds = array<i64: 32, 48>}, {pipeline_mode = #tpu.pipeline_mode<synchronous>, transform_indices = @transform_3, window_bounds = array<i64: 1, 48>}, {pipeline_mode = #tpu.pipeline_mode<synchronous>, transform_indices = @transform_4, window_bounds = array<i64: 32, 32>}, {pipeline_mode = #tpu.pipeline_mode<synchronous>, transform_indices = @transform_5, window_bounds = array<i64: 1, 32>}, {transform_indices = @transform_6, window_bounds = array<i64: 160, 48>}, {transform_indices = @transform_7, window_bounds = array<i64: 160, 32>}]} {
    %c0 = arith.constant 0 : index
    %c0_0 = arith.constant 0 : index
    %0 = vector.load %arg1[%c0, %c0_0] : memref<160x32xf32, #tpu.memory_space<vmem>>, vector<160x32xf32>
    %c0_1 = arith.constant 0 : index
    %c0_2 = arith.constant 0 : index
    %1 = vector.load %arg2[%c0_1, %c0_2] : memref<160x32xf32, #tpu.memory_space<vmem>>, vector<160x32xf32>
    %2 = arith.addf %0, %1 : vector<160x32xf32>
    %3 = arith.truncf %2 : vector<160x32xf32> to vector<160x32xbf16>
    %c0_3 = arith.constant 0 : index
    %c0_4 = arith.constant 0 : index
    %4 = vector.load %arg3[%c0_3, %c0_4] : memref<32x48xbf16, #tpu.memory_space<vmem>>, vector<32x48xbf16>
    %cst = arith.constant dense<0.000000e+00> : vector<160x48xf32>
    %5 = tpu.matmul %3, %4, %cst {dimension_numbers = #tpu.dot_dimension_numbers<[1], [0], [0], [1], [0, 0, 1, 1], [], []>} : vector<160x32xbf16>, vector<32x48xbf16>, vector<160x48xf32> -> vector<160x48xf32>
    %c0_5 = arith.constant 0 : index
    %c0_6 = arith.constant 0 : index
    %6 = vector.load %arg4[%c0_5, %c0_6] : memref<1x48xf32, #tpu.memory_space<vmem>>, vector<1x48xf32>
    %7 = vector.broadcast %6 : vector<1x48xf32> to vector<160x48xf32>
    %8 = arith.addf %5, %7 : vector<160x48xf32>
    %c0_7 = arith.constant 0 : index
    %c0_8 = arith.constant 0 : index
    %9 = vector.load %arg7[%c0_7, %c0_8] : memref<160x48xf32, #tpu.memory_space<vmem>>, vector<160x48xf32>
    tpu.vector_store %arg7[%c0_7, %c0_8], %8 {strides = array<i32>} : memref<160x48xf32, #tpu.memory_space<vmem>>, vector<160x48xf32>,
    %10 = arith.truncf %0 : vector<160x32xf32> to vector<160x32xbf16>
    %c0_9 = arith.constant 0 : index
    %c0_10 = arith.constant 0 : index
    %11 = vector.load %arg5[%c0_9, %c0_10] : memref<32x32xbf16, #tpu.memory_space<vmem>>, vector<32x32xbf16>
    %cst_11 = arith.constant dense<0.000000e+00> : vector<160x32xf32>
    %12 = tpu.matmul %10, %11, %cst_11 {dimension_numbers = #tpu.dot_dimension_numbers<[1], [0], [0], [1], [0, 0, 1, 1], [], []>} : vector<160x32xbf16>, vector<32x32xbf16>, vector<160x32xf32> -> vector<160x32xf32>
    %c0_12 = arith.constant 0 : index
    %c0_13 = arith.constant 0 : index
    %13 = vector.load %arg6[%c0_12, %c0_13] : memref<1x32xf32, #tpu.memory_space<vmem>>, vector<1x32xf32>
    %14 = vector.broadcast %13 : vector<1x32xf32> to vector<160x32xf32>
    %15 = arith.addf %12, %14 : vector<160x32xf32>
    %16 = arith.truncf %15 : vector<160x32xf32> to vector<160x32xbf16>
    %c0_14 = arith.constant 0 : index
    %c0_15 = arith.constant 0 : index
    %17 = vector.load %arg8[%c0_14, %c0_15] : memref<160x32xbf16, #tpu.memory_space<vmem>>, vector<160x32xbf16>
    tpu.vector_store %arg8[%c0_14, %c0_15], %16 {strides = array<i32>} : memref<160x32xbf16, #tpu.memory_space<vmem>>, vector<160x32xbf16>,
    return
  }
  func.func @transform_0(%arg0: i32) -> (i32, i32) {
    %c0_i32 = arith.constant 0 : i32
    %c0_i32_0 = arith.constant 0 : i32
    return %arg0, %c0_i32 : i32, i32
  }
  func.func @transform_1(%arg0: i32) -> (i32, i32) {
    %c0_i32 = arith.constant 0 : i32
    %c0_i32_0 = arith.constant 0 : i32
    return %arg0, %c0_i32 : i32, i32
  }
  func.func @transform_2(%arg0: i32) -> (i32, i32) {
    %c0_i32 = arith.constant 0 : i32
    %c0_i32_0 = arith.constant 0 : i32
    %c0_i32_1 = arith.constant 0 : i32
    return %c0_i32, %c0_i32_0 : i32, i32
  }
  func.func @transform_3(%arg0: i32) -> (i32, i32) {
    %c0_i32 = arith.constant 0 : i32
    %c0_i32_0 = arith.constant 0 : i32
    %c0_i32_1 = arith.constant 0 : i32
    return %c0_i32, %c0_i32_0 : i32, i32
  }
  func.func @transform_4(%arg0: i32) -> (i32, i32) {
    %c0_i32 = arith.constant 0 : i32
    %c0_i32_0 = arith.constant 0 : i32
    %c0_i32_1 = arith.constant 0 : i32
    return %c0_i32, %c0_i32_0 : i32, i32
  }
  func.func @transform_5(%arg0: i32) -> (i32, i32) {
    %c0_i32 = arith.constant 0 : i32
    %c0_i32_0 = arith.constant 0 : i32
    %c0_i32_1 = arith.constant 0 : i32
    return %c0_i32, %c0_i32_0 : i32, i32
  }
  func.func @transform_6(%arg0: i32) -> (i32, i32) {
    %c0_i32 = arith.constant 0 : i32
    %c0_i32_0 = arith.constant 0 : i32
    return %arg0, %c0_i32 : i32, i32
  }
  func.func @transform_7(%arg0: i32) -> (i32, i32) {
    %c0_i32 = arith.constant 0 : i32
    %c0_i32_0 = arith.constant 0 : i32
    return %arg0, %c0_i32 : i32, i32
  }
}

</mosaic_0001>

<bundles_post_ra>
// kernel: tpu_custom_call.1
= control target key start
LH: loop header
LB: loop body
LE: loop exit
PB: predicated region body
PF: predicated region fallthrough
CT: control target
= control target key end

     0   :  { %13 = vsyncpa [#allocation3], 0  ;;  %s1311_s0 = inlined_call_operand.hbm [shape: f32[160,32], index: 0, kind: input, shape index: {}]   ;;  %s1312_s1 = inlined_call_operand.hbm [shape: f32[160,32], index: 1, kind: input, shape index: {}]   ;;  %s1313_s2 = inlined_call_operand.hbm [shape: bf16[32,48], index: 2, kind: input, shape index: {}]   ;;  %s1314_s3 = inlined_call_operand.hbm [shape: f32[1,48], index: 3, kind: input, shape index: {}]   ;;  %s1315_s4 = inlined_call_operand.hbm [shape: bf16[32,32], index: 4, kind: input, shape index: {}]   ;;  %s1316_s5 = inlined_call_operand.hbm [shape: f32[1,32], index: 5, kind: input, shape index: {}]   ;;  %s1317_s6 = inlined_call_operand.hbm [shape: f32[160,48], index: 6, kind: output, shape index: {0}]   ;;  %s1318_s7 = inlined_call_operand.hbm [shape: bf16[160,32], index: 7, kind: output, shape index: {1}]  }
   0x1   :  { %14 = vsyncpa [#allocation6], 0 }
   0x2   :  { %15 = vsyncpa [#allocation9], 0 }
   0x3   :  { %16 = vsyncpa [#allocation12], 0 }
   0x4   :  { %17 = vsyncpa [#allocation4], 0 }
   0x5   :  { %18 = vsyncpa [#allocation15], 0  ;;  %s1019_s24 = smov [#allocation5]   ;;  %s1020_s26 = smov [#allocation8]  }
   0x6   :  { %s36_s25 = sshll.u32 %s1019_s24, 4  ;;  %s61_s27 = sshll.u32 %s1020_s26, 4  ;;  %s37_s25 = int_to_ptr.vmem [resolvable:$true] %s36_s25  ;;  %s1071_s27 = int_to_ptr.vmem [resolvable:$true] %s61_s27 }
   0x7   :  { %s831_s30 = scalar_lea.hbm %s1312_s1, 2560 }
   0x8   :  { %p832_p0 = scmp.ne.s32.totalorder %s1312_s1, %s831_s30  ;;  %p835_p1 = scmp.lt.u32.totalorder %s831_s30, %s1312_s1 }
   0xa   :  { %p837_p2 = pnand %p835_p1, %p832_p0 }
   0xc   :  { %840 = shalt.err (!%p837_p2)
}
   0xd   :  { %s841_s12 = scalar_lea.vmem %s37_s25, 2560  ;;  %p846_p4 = scmp.lt.s32.totalorder %s37_s25, %s37_s25 }
   0xe   :  { %p842_p3 = scmp.ne.s32.totalorder %s37_s25, %s841_s12  ;;  %p847_p5 = scmp.lt.s32.totalorder %s841_s12, %s841_s12 }
  0x10   :  { %p848_p6 = por %p847_p5, %p846_p4 }
  0x12   :  { %p849_p7 = pnand %p848_p6, %p842_p3 }
  0x14   :  { %852 = shalt.err (!%p849_p7)
}
  0x15   :  { %s1021_s13 = smov 128   ;;  %s1022_s14 = smov 8  }
  0x16   :  { %42 = dma.hbm_to_vmem [thread:$0]  %s1312_s1, 2560, %s37_s25, [#allocation6], %s1021_s13, %s1021_s13, %s1022_s14  }
  0x17   :  { %s853_s19 = scalar_lea.hbm %s1314_s3, 16 }
  0x18   :  { %p854_p8 = scmp.ne.s32.totalorder %s1314_s3, %s853_s19  ;;  %p857_p9 = scmp.lt.u32.totalorder %s853_s19, %s1314_s3 }
  0x1a   :  { %p859_p10 = pnand %p857_p9, %p854_p8 }
  0x1c   :  { %862 = shalt.err (!%p859_p10)
}
  0x1d   :  { %s863_s24 = scalar_lea.vmem %s1071_s27, 16  ;;  %s867_s1 = scalar_lea.vmem %s1071_s27, 32 }
  0x1e   :  { %p864_p11 = scmp.ne.s32.totalorder %s1071_s27, %s863_s24  ;;  %p868_p12 = scmp.lt.s32.totalorder %s1071_s27, %s1071_s27 }
  0x1f   :  { %p869_p13 = scmp.lt.s32.totalorder %s867_s1, %s863_s24 }
  0x21   :  { %p870_p0 = por %p869_p13, %p868_p12 }
  0x23   :  { %p871_p1 = pnand %p870_p0, %p864_p11 }
  0x25   :  { %874 = shalt.err (!%p871_p1)
}
  0x26   :  { %64 = dma.hbm_to_vmem [thread:$0]  %s1314_s3, 16, %s1071_s27, [#allocation9]  }
  0x27   :  { %s1023_s28 = smov [#allocation2]   ;;  %s1024_s30 = smov [#allocation7]  }
  0x28   :  { %s24_s29 = sshll.u32 %s1023_s28, 4  ;;  %s48_s8 = sshll.u32 %s1024_s30, 4  ;;  %s25_s29 = int_to_ptr.vmem [resolvable:$true] %s24_s29  ;;  %s1106_s8 = int_to_ptr.vmem [resolvable:$true] %s48_s8 }
  0x29   :  { %s875_s11 = scalar_lea.hbm %s1311_s0, 2560 }
  0x2a   :  { %p876_p2 = scmp.ne.s32.totalorder %s1311_s0, %s875_s11  ;;  %p879_p3 = scmp.lt.u32.totalorder %s875_s11, %s1311_s0 }
  0x2c   :  { %p881_p4 = pnand %p879_p3, %p876_p2 }
  0x2e   :  { %884 = shalt.err (!%p881_p4)
}
  0x2f   :  { %s885_s3 = scalar_lea.vmem %s25_s29, 2560  ;;  %p890_p6 = scmp.lt.s32.totalorder %s25_s29, %s25_s29 }
  0x30   :  { %p886_p5 = scmp.ne.s32.totalorder %s25_s29, %s885_s3  ;;  %p891_p7 = scmp.lt.s32.totalorder %s885_s3, %s885_s3 }
  0x32   :  { %p892_p8 = por %p891_p7, %p890_p6 }
  0x34   :  { %p893_p9 = pnand %p892_p8, %p886_p5 }
  0x36   :  { %896 = shalt.err (!%p893_p9)
}
  0x37   :  { %30 = dma.hbm_to_vmem [thread:$0]  %s1311_s0, 2560, %s25_s29, [#allocation3], %s1021_s13, %s1021_s13, %s1022_s14  }
  0x38   :  { %s897_s21 = scalar_lea.hbm %s1313_s2, 256 }
  0x39   :  { %p898_p10 = scmp.ne.s32.totalorder %s1313_s2, %s897_s21  ;;  %p901_p11 = scmp.lt.u32.totalorder %s897_s21, %s1313_s2 }
  0x3b   :  { %p903_p12 = pnand %p901_p11, %p898_p10 }
  0x3d   :  { %906 = shalt.err (!%p903_p12)
}
  0x3e   :  { %s907_s25 = scalar_lea.vmem %s1106_s8, 256  ;;  %p912_p0 = scmp.lt.s32.totalorder %s1106_s8, %s1106_s8 }
  0x3f   :  { %p908_p13 = scmp.ne.s32.totalorder %s1106_s8, %s907_s25  ;;  %p913_p1 = scmp.lt.s32.totalorder %s907_s25, %s907_s25 }
  0x41   :  { %p914_p2 = por %p913_p1, %p912_p0 }
  0x43   :  { %p915_p3 = pnand %p914_p2, %p908_p13 }
  0x45   :  { %918 = shalt.err (!%p915_p3)
}
  0x46   :  { %s1025_s0 = smov 64   ;;  %s1026_s26 = smov 4  }
  0x47   :  { %54 = dma.hbm_to_vmem [thread:$0]  %s1313_s2, 256, %s1106_s8, [#allocation6], %s1025_s0, %s1025_s0, %s1026_s26  }
  0x48   :  { %s1027_s30 = smov [#allocation10]   ;;  %s1028_s10 = smov [#allocation11]  }
  0x49   :  { %s70_s9 = sshll.u32 %s1027_s30, 4  ;;  %s83_s11 = sshll.u32 %s1028_s10, 4  ;;  %s71_s9 = int_to_ptr.vmem [resolvable:$true] %s70_s9  ;;  %s84_s11 = int_to_ptr.vmem [resolvable:$true] %s83_s11 }
  0x4a   :  { %s919_s16 = scalar_lea.hbm %s1315_s4, 256 }
  0x4b   :  { %p920_p4 = scmp.ne.s32.totalorder %s1315_s4, %s919_s16  ;;  %p923_p5 = scmp.lt.u32.totalorder %s919_s16, %s1315_s4 }
  0x4d   :  { %p925_p6 = pnand %p923_p5, %p920_p4 }
  0x4f   :  { %928 = shalt.err (!%p925_p6)
}
  0x50   :  { %s929_s2 = scalar_lea.vmem %s71_s9, 256  ;;  %p934_p8 = scmp.lt.s32.totalorder %s71_s9, %s71_s9 }
  0x51   :  { %p930_p7 = scmp.ne.s32.totalorder %s71_s9, %s929_s2  ;;  %p935_p9 = scmp.lt.s32.totalorder %s929_s2, %s929_s2 }
  0x53   :  { %p936_p10 = por %p935_p9, %p934_p8 }
  0x55   :  { %p937_p11 = pnand %p936_p10, %p930_p7 }
  0x57   :  { %940 = shalt.err (!%p937_p11)
}
  0x58   :  { %76 = dma.hbm_to_vmem [thread:$0]  %s1315_s4, 256, %s71_s9, [#allocation9], %s1025_s0, %s1025_s0, %s1026_s26  }
  0x59   :  { %s941_s22 = scalar_lea.hbm %s1316_s5, 16 }
  0x5a   :  { %p942_p12 = scmp.ne.s32.totalorder %s1316_s5, %s941_s22  ;;  %p945_p13 = scmp.lt.u32.totalorder %s941_s22, %s1316_s5 }
  0x5c   :  { %p947_p0 = pnand %p945_p13, %p942_p12 }
  0x5e   :  { %950 = shalt.err (!%p947_p0)
}
  0x5f   :  { %s951_s28 = scalar_lea.vmem %s84_s11, 16  ;;  %s955_s29 = scalar_lea.vmem %s84_s11, 32 }
  0x60   :  { %p952_p1 = scmp.ne.s32.totalorder %s84_s11, %s951_s28  ;;  %p956_p2 = scmp.lt.s32.totalorder %s84_s11, %s84_s11 }
  0x61   :  { %p957_p3 = scmp.lt.s32.totalorder %s955_s29, %s951_s28 }
  0x63   :  { %p958_p4 = por %p957_p3, %p956_p2 }
  0x65   :  { %p959_p5 = pnand %p958_p4, %p952_p1 }
  0x67   :  { %962 = shalt.err (!%p959_p5)
}
  0x68   :  { %86 = dma.hbm_to_vmem [thread:$0]  %s1316_s5, 16, %s84_s11, [#allocation12]  }
  0x69   :  { %1007 = dma.done.wait [#allocation3], 2560  }
  0x6a   :  { %1008 = vsyncadd [#allocation3], 4294964736 }
  0x6b   :  { %1009 = dma.done.wait [#allocation6], 2816  }
  0x6c   :  { %1010 = vsyncadd [#allocation6], 4294964480 }
  0x6d   :  { %1011 = dma.done.wait [#allocation9], 272  }
  0x6e   :  { %1012 = vsyncadd [#allocation9], 4294967024 }
  0x6f   :  { %1013 = dma.done.wait [#allocation12], 16  }
  0x70   :  { %1014 = vsyncadd [#allocation12], 4294967280  ;;  %v827_v0 = vld [vmem:[#allocation7] sm:$0xff]   ;;  %v828_v1 = vld [vmem:[#allocation10] sm:$0xff]   ;;  %vm199_vm0 = vcmask 261120   ;;  %vm343_vm1 = vcmask 392192  }
  0x71   :  { %767 = vmatprep.subr.bf16.mxu0 %v827_v0  ;;  %v829_v2 = vld [vmem:[#allocation7 + $0x8] sm:$0xff]   ;;  %791 = vmatprep.subr.bf16.mxu1 %v828_v1  ;;  %v830_v3 = vld [vmem:[#allocation10 + $0x8] sm:$0xff]   ;;  %v108_v10 = vld [vmem:[#allocation2 + $0x10] sm:$0xff]  ;;  %vm620_vm2 = vcmask 257024   ;;  %s1029_s5 = smov [#allocation13]   ;;  %s1030_s10 = smov [#allocation14]  }
  0x72   :  { %768 = vmatpush3.bf16.msra.mxu0 %v827_v0  ;;  %792 = vmatpush3.bf16.msra.mxu1 %v828_v1  ;;  %v106_v4 = vld [vmem:[#allocation2] sm:$0xff]  ;;  %v107_v5 = vld [vmem:[#allocation2 + $0x8] sm:$0xff]  ;;  %v109_v11 = vld [vmem:[#allocation2 + $0x18] sm:$0xff]  ;;  %s646_s9 = sshll.u32 %s1029_s5, 4  ;;  %s658_s11 = sshll.u32 %s1030_s10, 4  ;;  %s647_s9 = int_to_ptr.vmem [resolvable:$true] %s646_s9  ;;  %s1272_s11 = int_to_ptr.vmem [resolvable:$true] %s658_s11 }
  0x73   :  { %769 = vmatprep.subr.bf16.mxu0 %v829_v2  ;;  %v126_v6 = vld [vmem:[#allocation5] sm:$0xff]  ;;  %793 = vmatprep.subr.bf16.mxu1 %v830_v3  ;;  %v127_v7 = vld [vmem:[#allocation5 + $0x8] sm:$0xff]  ;;  %v364_v9 = vpack.c.bf16 %v107_v5, %v106_v4  ;;  %v128_v13 = vld [vmem:[#allocation5 + $0x10] sm:$0xff]  ;;  %v365_v18 = vpack.c.bf16 %v109_v11, %v108_v10  ;;  %s963_s12 = scalar_lea.vmem %s647_s9, 2560  ;;  %p968_p7 = scmp.lt.s32.totalorder %s647_s9, %s647_s9 }
  0x74   :  { %v146_v8 = vadd.f32 %v126_v6, %v106_v4  ;;  %v147_v12 = vadd.f32 %v127_v7, %v107_v5  ;;  %v129_v14 = vld [vmem:[#allocation5 + $0x18] sm:$0xff]  ;;  %v110_v15 = vld [vmem:[#allocation2 + $0x20] sm:$0xff]  ;;  %v148_v16 = vadd.f32 %v128_v13, %v108_v10  ;;  %v111_v19 = vld [vmem:[#allocation2 + $0x28] sm:$0xff]  ;;  %p964_p6 = scmp.ne.s32.totalorder %s647_s9, %s963_s12  ;;  %p969_p8 = scmp.lt.s32.totalorder %s963_s12, %s963_s12 }
  0x75   :  { %795 = vmatprep.mubr.msk.bf16.mxu1 %vm199_vm0, %v364_v9  ;;  %v149_v17 = vadd.f32 %v129_v14, %v109_v11  ;;  %v130_v20 = vld [vmem:[#allocation5 + $0x20] sm:$0xff]  ;;  %v131_v21 = vld [vmem:[#allocation5 + $0x28] sm:$0xff]  ;;  %v366_v25 = vpack.c.bf16 %v111_v19, %v110_v15  ;;  %v112_v26 = vld [vmem:[#allocation2 + $0x30] sm:$0xff] }
  0x76   :  { %770 = vmatpush3.bf16.msra.mxu0 %v829_v2  ;;  %794 = vmatpush3.bf16.msra.mxu1 %v830_v3  ;;  %v166_v22 = vpack.c.bf16 %v147_v12, %v146_v8  ;;  %v150_v23 = vadd.f32 %v130_v20, %v110_v15  ;;  %v151_v24 = vadd.f32 %v131_v21, %v111_v19  ;;  %v113_v27 = vld [vmem:[#allocation2 + $0x38] sm:$0xff]  ;;  %v132_v28 = vld [vmem:[#allocation5 + $0x30] sm:$0xff]  ;;  %v114_v31 = vld [vmem:[#allocation2 + $0x40] sm:$0xff]  ;;  %p970_p9 = por %p969_p8, %p968_p7 }
  0x77   :  { %v167_v29 = vpack.c.bf16 %v149_v17, %v148_v16  ;;  %v133_v30 = vld [vmem:[#allocation5 + $0x38] sm:$0xff]  ;;  %v115_v32 = vld [vmem:[#allocation2 + $0x48] sm:$0xff]  ;;  %v134_v34 = vld [vmem:[#allocation5 + $0x40] sm:$0xff]  ;;  %v152_v36 = vadd.f32 %v132_v28, %v112_v26  ;;  %v367_v41 = vpack.c.bf16 %v113_v27, %v112_v26 }
  0x78   :  { %771 = vmatprep.mubr.msk.bf16.mxu0 %vm199_vm0, %v166_v22  ;;  %v168_v33 = vpack.c.bf16 %v151_v24, %v150_v23  ;;  %v135_v35 = vld [vmem:[#allocation5 + $0x48] sm:$0xff]  ;;  %v153_v37 = vadd.f32 %v133_v30, %v113_v27  ;;  %v154_v38 = vadd.f32 %v134_v34, %v114_v31  ;;  %v116_v42 = vld [vmem:[#allocation2 + $0x50] sm:$0xff]  ;;  %v117_v43 = vld [vmem:[#allocation2 + $0x58] sm:$0xff]  ;;  %v368_v45 = vpack.c.bf16 %v115_v32, %v114_v31  ;;  %p971_p10 = pnand %p970_p9, %p964_p6 }
  0x79   :  { %772 = vmatmul.mubr.msk.bf16.vlgmr.msra.gmra.mrb[0].mxu0 %vm199_vm0, %v167_v29  ;;  %796 = vmatmul.mubr.msk.bf16.vlgmr.msra.gmra.mrb[0].mxu1 %vm199_vm0, %v365_v18  ;;  %v155_v39 = vadd.f32 %v135_v35, %v115_v32  ;;  %v136_v46 = vld [vmem:[#allocation5 + $0x50] sm:$0xff]  ;;  %v137_v47 = vld [vmem:[#allocation5 + $0x58] sm:$0xff]  ;;  %v118_v48 = vld [vmem:[#allocation2 + $0x60] sm:$0xff]  ;;  %v369_v57 = vpack.c.bf16 %v117_v43, %v116_v42 }
  0x7a   :  { %775 = vmatprep.mubr.msk.bf16.mxu0 %vm199_vm0, %v168_v33  ;;  %799 = vmatprep.mubr.msk.bf16.mxu1 %vm199_vm0, %v366_v25  ;;  %v169_v40 = vpack.c.bf16 %v153_v37, %v152_v36  ;;  %v119_v49 = vld [vmem:[#allocation2 + $0x68] sm:$0xff]  ;;  %v138_v50 = vld [vmem:[#allocation5 + $0x60] sm:$0xff]  ;;  %v156_v52 = vadd.f32 %v136_v46, %v116_v42  ;;  %v157_v53 = vadd.f32 %v137_v47, %v117_v43  ;;  %v120_v58 = vld [vmem:[#allocation2 + $0x70] sm:$0xff] }
  0x7b   :  { %v170_v44 = vpack.c.bf16 %v155_v39, %v154_v38  ;;  %v139_v51 = vld [vmem:[#allocation5 + $0x68] sm:$0xff]  ;;  %v158_v54 = vadd.f32 %v138_v50, %v118_v48  ;;  %v121_v59 = vld [vmem:[#allocation2 + $0x78] sm:$0xff]  ;;  %v370_v61 = vpack.c.bf16 %v119_v49, %v118_v48  ;;  %v140_v62 = vld [vmem:[#allocation5 + $0x70] sm:$0xff] }
  0x7c   :  { %v159_v55 = vadd.f32 %v139_v51, %v119_v49  ;;  %v171_v56 = vpack.c.bf16 %v157_v53, %v156_v52  ;;  %v141_v63 = vld [vmem:[#allocation5 + $0x78] sm:$0xff]  ;;  %v122_v0 = vld [vmem:[#allocation2 + $0x80] sm:$0xff]  ;;  %v123_v1 = vld [vmem:[#allocation2 + $0x88] sm:$0xff]  ;;  %v160_v4 = vadd.f32 %v140_v62, %v120_v58  ;;  %v371_v9 = vpack.c.bf16 %v121_v59, %v120_v58 }
  0x7d   :  { %v142_v2 = vld [vmem:[#allocation5 + $0x80] sm:$0xff]  ;;  %v143_v3 = vld [vmem:[#allocation5 + $0x88] sm:$0xff]  ;;  %v161_v5 = vadd.f32 %v141_v63, %v121_v59  ;;  %v124_v10 = vld [vmem:[#allocation2 + $0x90] sm:$0xff]  ;;  %v372_v12 = vpack.c.bf16 %v123_v1, %v122_v0 }
  0x7e   :  { %v172_v60 = vpack.c.bf16 %v159_v55, %v158_v54  ;;  %v162_v6 = vadd.f32 %v142_v2, %v122_v0  ;;  %v163_v7 = vadd.f32 %v143_v3, %v123_v1  ;;  %v125_v13 = vld [vmem:[#allocation2 + $0x98] sm:$0xff]  ;;  %v144_v14 = vld [vmem:[#allocation5 + $0x90] sm:$0xff]  ;;  %v1192_v21 = vld [vmem:[#allocation11] ss:$0 sm:$0xff] }
  0x7f   :  { %v173_v8 = vpack.c.bf16 %v161_v5, %v160_v4  ;;  %v145_v15 = vld [vmem:[#allocation5 + $0x98] sm:$0xff]  ;;  %v164_v16 = vadd.f32 %v144_v14, %v124_v10  ;;  %v373_v19 = vpack.c.bf16 %v125_v13, %v124_v10  ;;  %v1190_v20 = vld [vmem:[#allocation8] ss:$0 sm:$0xff] }
  0x80   :  { %v174_v11 = vpack.c.bf16 %v163_v7, %v162_v6  ;;  %v165_v17 = vadd.f32 %v145_v15, %v125_v13 }
  0x81   :  { %776 = vmatmul.mubr.msk.bf16.gmra.mrb[4].mxu0 %vm199_vm0, %v169_v40  ;;  %800 = vmatmul.mubr.msk.bf16.gmra.mrb[4].mxu1 %vm199_vm0, %v367_v41 }
  0x82   :  { %779 = vmatprep.mubr.msk.bf16.mxu0 %vm199_vm0, %v170_v44  ;;  %803 = vmatprep.mubr.msk.bf16.mxu1 %vm199_vm0, %v368_v45  ;;  %v175_v18 = vpack.c.bf16 %v165_v17, %v164_v16 }
  0x89   :  { %780 = vmatmul.mubr.msk.bf16.gmra.mrb[8].mxu0 %vm199_vm0, %v171_v56  ;;  %804 = vmatmul.mubr.msk.bf16.gmra.mrb[8].mxu1 %vm199_vm0, %v369_v57 }
  0x8a   :  { %783 = vmatprep.mubr.msk.bf16.mxu0 %vm199_vm0, %v172_v60  ;;  %807 = vmatprep.mubr.msk.bf16.mxu1 %vm199_vm0, %v370_v61 }
  0x91   :  { %784 = vmatmul.mubr.msk.bf16.gmra.mrb[12].mxu0 %vm199_vm0, %v173_v8  ;;  %808 = vmatmul.mubr.msk.bf16.gmra.mrb[12].mxu1 %vm199_vm0, %v371_v9 }
  0x92   :  { %787 = vmatprep.mubr.msk.bf16.mxu0 %vm199_vm0, %v174_v11  ;;  %811 = vmatprep.mubr.msk.bf16.mxu1 %vm199_vm0, %v372_v12 }
  0x99   :  { %788 = vmatmul.mubr.msk.bf16.gmra.mrb[16].mxu0 %vm199_vm0, %v175_v18  ;;  %812 = vmatmul.mubr.msk.bf16.gmra.mrb[16].mxu1 %vm199_vm0, %v373_v19 }
 0x14c   :  { %v773_v22 = vpop.f32.mrb[0].mxu0  ;;  %v797_v23 = vpop.f32.mrb[0].mxu1 }
 0x14d   :  { %v273_v24 = vadd.f32 %v773_v22, %v1190_v20  ;;  %v470_v25 = vadd.f32 %v797_v23, %v1192_v21  ;;  %v264_v26 = vpop.f32.mrb[1].mxu0  ;;  %v461_v27 = vpop.f32.mrb[1].mxu1 }
 0x14e   :  { %v265_v28 = vadd.f32 %v1190_v20, %v264_v26  ;;  %v462_v29 = vadd.f32 %v1192_v21, %v461_v27  ;;  %v774_v30 = vpop.f32.mrb[2].mxu0  ;;  %v798_v31 = vpop.f32.mrb[2].mxu1 }
 0x14f   :  { %346 = vst.msk [vmem:[#allocation13 + $0x10] sm:$0xff] %vm343_vm1, %v273_v24  ;;  %v725_v32 = vpack.c.bf16 %v470_v25, %v470_v25  ;;  %v276_v33 = vadd.f32 %v774_v30, %v1190_v20  ;;  %v473_v34 = vadd.f32 %v798_v31, %v1192_v21  ;;  %v267_v35 = vpop.f32.mrb[3].mxu0  ;;  %v464_v36 = vpop.f32.mrb[3].mxu1 }
 0x150   :  { %344 = vst.msk [vmem:[#allocation13] sm:$0xff] %vm343_vm1, %v265_v28  ;;  %v723_v37 = vpack.c.bf16 %v462_v29, %v462_v29  ;;  %v268_v38 = vadd.f32 %v1190_v20, %v267_v35  ;;  %v465_v39 = vadd.f32 %v1192_v21, %v464_v36 }
 0x151   :  { %623 = vst.msk [vmem:[#allocation14 + $0x8] sm:$0xf] %vm620_vm2, %v725_v32  ;;  %v726_v40 = vpack.c.bf16 %v473_v34, %v473_v34 }
 0x152   :  { %347 = vst.msk [vmem:[#allocation13 + $0x18] sm:$0xff] %vm343_vm1, %v276_v33  ;;  %345 = vst.msk [vmem:[#allocation13 + $0x8] sm:$0xff] %vm343_vm1, %v268_v38  ;;  %v724_v41 = vpack.c.bf16 %v465_v39, %v465_v39 }
 0x153   :  { %621 = vst.msk [vmem:[#allocation14] sm:$0xf] %vm620_vm2, %v723_v37  ;;  %624 = vst.msk [vmem:[#allocation14 + $0xc] sm:$0xf] %vm620_vm2, %v726_v40 }
 0x154   :  { %622 = vst.msk [vmem:[#allocation14 + $0x4] sm:$0xf] %vm620_vm2, %v724_v41  ;;  %v777_v42 = vpop.f32.mrb[4].mxu0  ;;  %v801_v43 = vpop.f32.mrb[4].mxu1 }
 0x155   :  { %v289_v44 = vadd.f32 %v777_v42, %v1190_v20  ;;  %v486_v45 = vadd.f32 %v801_v43, %v1192_v21  ;;  %v280_v46 = vpop.f32.mrb[5].mxu0  ;;  %v477_v47 = vpop.f32.mrb[5].mxu1 }
 0x156   :  { %v281_v48 = vadd.f32 %v1190_v20, %v280_v46  ;;  %v478_v49 = vadd.f32 %v1192_v21, %v477_v47  ;;  %v778_v50 = vpop.f32.mrb[6].mxu0  ;;  %v802_v51 = vpop.f32.mrb[6].mxu1 }
 0x157   :  { %350 = vst.msk [vmem:[#allocation13 + $0x30] sm:$0xff] %vm343_vm1, %v289_v44  ;;  %v729_v52 = vpack.c.bf16 %v486_v45, %v486_v45  ;;  %v292_v53 = vadd.f32 %v778_v50, %v1190_v20  ;;  %v489_v54 = vadd.f32 %v802_v51, %v1192_v21  ;;  %v283_v55 = vpop.f32.mrb[7].mxu0  ;;  %v480_v56 = vpop.f32.mrb[7].mxu1 }
 0x158   :  { %348 = vst.msk [vmem:[#allocation13 + $0x20] sm:$0xff] %vm343_vm1, %v281_v48  ;;  %v727_v57 = vpack.c.bf16 %v478_v49, %v478_v49  ;;  %v284_v58 = vadd.f32 %v1190_v20, %v283_v55  ;;  %v481_v59 = vadd.f32 %v1192_v21, %v480_v56 }
 0x159   :  { %627 = vst.msk [vmem:[#allocation14 + $0x18] sm:$0xf] %vm620_vm2, %v729_v52  ;;  %v730_v60 = vpack.c.bf16 %v489_v54, %v489_v54 }
 0x15a   :  { %351 = vst.msk [vmem:[#allocation13 + $0x38] sm:$0xff] %vm343_vm1, %v292_v53  ;;  %349 = vst.msk [vmem:[#allocation13 + $0x28] sm:$0xff] %vm343_vm1, %v284_v58  ;;  %v728_v61 = vpack.c.bf16 %v481_v59, %v481_v59 }
 0x15b   :  { %625 = vst.msk [vmem:[#allocation14 + $0x10] sm:$0xf] %vm620_vm2, %v727_v57  ;;  %628 = vst.msk [vmem:[#allocation14 + $0x1c] sm:$0xf] %vm620_vm2, %v730_v60 }
 0x15c   :  { %626 = vst.msk [vmem:[#allocation14 + $0x14] sm:$0xf] %vm620_vm2, %v728_v61  ;;  %v781_v62 = vpop.f32.mrb[8].mxu0  ;;  %v805_v63 = vpop.f32.mrb[8].mxu1 }
 0x15d   :  { %v305_v0 = vadd.f32 %v781_v62, %v1190_v20  ;;  %v502_v1 = vadd.f32 %v805_v63, %v1192_v21  ;;  %v296_v2 = vpop.f32.mrb[9].mxu0  ;;  %v493_v3 = vpop.f32.mrb[9].mxu1 }
 0x15e   :  { %v297_v4 = vadd.f32 %v1190_v20, %v296_v2  ;;  %v494_v5 = vadd.f32 %v1192_v21, %v493_v3  ;;  %v782_v6 = vpop.f32.mrb[10].mxu0  ;;  %v806_v7 = vpop.f32.mrb[10].mxu1 }
 0x15f   :  { %354 = vst.msk [vmem:[#allocation13 + $0x50] sm:$0xff] %vm343_vm1, %v305_v0  ;;  %v733_v8 = vpack.c.bf16 %v502_v1, %v502_v1  ;;  %v308_v9 = vadd.f32 %v782_v6, %v1190_v20  ;;  %v505_v10 = vadd.f32 %v806_v7, %v1192_v21  ;;  %v299_v11 = vpop.f32.mrb[11].mxu0  ;;  %v496_v12 = vpop.f32.mrb[11].mxu1 }
 0x160   :  { %352 = vst.msk [vmem:[#allocation13 + $0x40] sm:$0xff] %vm343_vm1, %v297_v4  ;;  %v731_v13 = vpack.c.bf16 %v494_v5, %v494_v5  ;;  %v300_v14 = vadd.f32 %v1190_v20, %v299_v11  ;;  %v497_v15 = vadd.f32 %v1192_v21, %v496_v12 }
 0x161   :  { %631 = vst.msk [vmem:[#allocation14 + $0x28] sm:$0xf] %vm620_vm2, %v733_v8  ;;  %v734_v16 = vpack.c.bf16 %v505_v10, %v505_v10 }
 0x162   :  { %355 = vst.msk [vmem:[#allocation13 + $0x58] sm:$0xff] %vm343_vm1, %v308_v9  ;;  %353 = vst.msk [vmem:[#allocation13 + $0x48] sm:$0xff] %vm343_vm1, %v300_v14  ;;  %v732_v17 = vpack.c.bf16 %v497_v15, %v497_v15 }
 0x163   :  { %629 = vst.msk [vmem:[#allocation14 + $0x20] sm:$0xf] %vm620_vm2, %v731_v13  ;;  %632 = vst.msk [vmem:[#allocation14 + $0x2c] sm:$0xf] %vm620_vm2, %v734_v16 }
 0x164   :  { %630 = vst.msk [vmem:[#allocation14 + $0x24] sm:$0xf] %vm620_vm2, %v732_v17  ;;  %v785_v18 = vpop.f32.mrb[12].mxu0  ;;  %v809_v19 = vpop.f32.mrb[12].mxu1 }
 0x165   :  { %v321_v22 = vadd.f32 %v785_v18, %v1190_v20  ;;  %v518_v23 = vadd.f32 %v809_v19, %v1192_v21  ;;  %v312_v24 = vpop.f32.mrb[13].mxu0  ;;  %v509_v25 = vpop.f32.mrb[13].mxu1 }
 0x166   :  { %v313_v26 = vadd.f32 %v1190_v20, %v312_v24  ;;  %v510_v27 = vadd.f32 %v1192_v21, %v509_v25  ;;  %v786_v28 = vpop.f32.mrb[14].mxu0  ;;  %v810_v29 = vpop.f32.mrb[14].mxu1 }
 0x167   :  { %358 = vst.msk [vmem:[#allocation13 + $0x70] sm:$0xff] %vm343_vm1, %v321_v22  ;;  %v737_v30 = vpack.c.bf16 %v518_v23, %v518_v23  ;;  %v324_v31 = vadd.f32 %v786_v28, %v1190_v20  ;;  %v521_v32 = vadd.f32 %v810_v29, %v1192_v21  ;;  %v315_v33 = vpop.f32.mrb[15].mxu0  ;;  %v512_v34 = vpop.f32.mrb[15].mxu1 }
 0x168   :  { %356 = vst.msk [vmem:[#allocation13 + $0x60] sm:$0xff] %vm343_vm1, %v313_v26  ;;  %v735_v35 = vpack.c.bf16 %v510_v27, %v510_v27  ;;  %v316_v36 = vadd.f32 %v1190_v20, %v315_v33  ;;  %v513_v37 = vadd.f32 %v1192_v21, %v512_v34 }
 0x169   :  { %635 = vst.msk [vmem:[#allocation14 + $0x38] sm:$0xf] %vm620_vm2, %v737_v30  ;;  %v738_v38 = vpack.c.bf16 %v521_v32, %v521_v32 }
 0x16a   :  { %359 = vst.msk [vmem:[#allocation13 + $0x78] sm:$0xff] %vm343_vm1, %v324_v31  ;;  %357 = vst.msk [vmem:[#allocation13 + $0x68] sm:$0xff] %vm343_vm1, %v316_v36  ;;  %v736_v39 = vpack.c.bf16 %v513_v37, %v513_v37 }
 0x16b   :  { %633 = vst.msk [vmem:[#allocation14 + $0x30] sm:$0xf] %vm620_vm2, %v735_v35  ;;  %636 = vst.msk [vmem:[#allocation14 + $0x3c] sm:$0xf] %vm620_vm2, %v738_v38 }
 0x16c   :  { %634 = vst.msk [vmem:[#allocation14 + $0x34] sm:$0xf] %vm620_vm2, %v736_v39  ;;  %v789_v40 = vpop.f32.mrb[16].mxu0  ;;  %v813_v41 = vpop.f32.mrb[16].mxu1 }
 0x16d   :  { %v337_v42 = vadd.f32 %v789_v40, %v1190_v20  ;;  %v534_v43 = vadd.f32 %v813_v41, %v1192_v21  ;;  %v328_v44 = vpop.f32.mrb[17].mxu0  ;;  %v525_v45 = vpop.f32.mrb[17].mxu1 }
 0x16e   :  { %v329_v46 = vadd.f32 %v1190_v20, %v328_v44  ;;  %v526_v47 = vadd.f32 %v1192_v21, %v525_v45  ;;  %v790_v48 = vpop.f32.mrb[18].mxu0  ;;  %v814_v49 = vpop.f32.mrb[18].mxu1 }
 0x16f   :  { %362 = vst.msk [vmem:[#allocation13 + $0x90] sm:$0xff] %vm343_vm1, %v337_v42  ;;  %v741_v50 = vpack.c.bf16 %v534_v43, %v534_v43  ;;  %v340_v51 = vadd.f32 %v790_v48, %v1190_v20  ;;  %v537_v52 = vadd.f32 %v814_v49, %v1192_v21  ;;  %v331_v53 = vpop.f32.mrb[19].mxu0  ;;  %v528_v54 = vpop.f32.mrb[19].mxu1 }
 0x170   :  { %360 = vst.msk [vmem:[#allocation13 + $0x80] sm:$0xff] %vm343_vm1, %v329_v46  ;;  %v739_v55 = vpack.c.bf16 %v526_v47, %v526_v47  ;;  %v332_v56 = vadd.f32 %v1190_v20, %v331_v53  ;;  %v529_v57 = vadd.f32 %v1192_v21, %v528_v54 }
 0x171   :  { %639 = vst.msk [vmem:[#allocation14 + $0x48] sm:$0xf] %vm620_vm2, %v741_v50  ;;  %v742_v58 = vpack.c.bf16 %v537_v52, %v537_v52 }
 0x172   :  { %363 = vst.msk [vmem:[#allocation13 + $0x98] sm:$0xff] %vm343_vm1, %v340_v51  ;;  %361 = vst.msk [vmem:[#allocation13 + $0x88] sm:$0xff] %vm343_vm1, %v332_v56  ;;  %v740_v59 = vpack.c.bf16 %v529_v57, %v529_v57 }
 0x173   :  { %637 = vst.msk [vmem:[#allocation14 + $0x40] sm:$0xf] %vm620_vm2, %v739_v55  ;;  %640 = vst.msk [vmem:[#allocation14 + $0x4c] sm:$0xf] %vm620_vm2, %v742_v58 }
 0x174   :  { %974 = shalt.err (!%p971_p10)
}
 0x175   :  { %s975_s17 = scalar_lea.hbm %s1317_s6, 2560 }
 0x176   :  { %p976_p11 = scmp.ne.s32.totalorder %s1317_s6, %s975_s17  ;;  %p979_p12 = scmp.lt.u32.totalorder %s975_s17, %s1317_s6 }
 0x178   :  { %p981_p13 = pnand %p979_p12, %p976_p11 }
 0x17a   :  { %984 = shalt.err (!%p981_p13)
}
 0x17b   :  { %652 = dma.vmem_to_hbm [thread:$0]  %s647_s9, 2560, %s1317_s6, [#allocation4], %s1021_s13, %s1021_s13, %s1022_s14   ;;  %638 = vst.msk [vmem:[#allocation14 + $0x44] sm:$0xf] %vm620_vm2, %v740_v59 }
 0x17c   :  { %s985_s20 = scalar_lea.vmem %s1272_s11, 1280  ;;  %p990_p1 = scmp.lt.s32.totalorder %s1272_s11, %s1272_s11 }
 0x17d   :  { %p986_p0 = scmp.ne.s32.totalorder %s1272_s11, %s985_s20  ;;  %p991_p2 = scmp.lt.s32.totalorder %s985_s20, %s985_s20 }
 0x17f   :  { %p992_p3 = por %p991_p2, %p990_p1 }
 0x181   :  { %p993_p4 = pnand %p992_p3, %p986_p0 }
 0x183   :  { %996 = shalt.err (!%p993_p4)
}
 0x184   :  { %s997_s23 = scalar_lea.hbm %s1318_s7, 1280 }
 0x185   :  { %p998_p5 = scmp.ne.s32.totalorder %s1318_s7, %s997_s23  ;;  %p1001_p6 = scmp.lt.u32.totalorder %s997_s23, %s1318_s7 }
 0x187   :  { %p1003_p7 = pnand %p1001_p6, %p998_p5 }
 0x189   :  { %1006 = shalt.err (!%p1003_p7)
}
 0x18a   :  { %664 = dma.vmem_to_hbm [thread:$0]  %s1272_s11, 1280, %s1318_s7, [#allocation15], %s1025_s0, %s1025_s0, %s1026_s26  }
 0x18b   :  { %1015 = dma.done.wait [#allocation4], 2560  }
 0x18c   :  { %1016 = vsyncadd [#allocation4], 4294964736 }
 0x18d   :  { %1017 = dma.done.wait [#allocation15], 1280  }
 0x18e   :  { %1018 = vsyncadd [#allocation15], 4294966016 }
 0x18f   :  { %671 = vsyncpa [#allocation3], 1 }
 0x190   :  { %672 = vsyncpa [#allocation6], 1 }
 0x191   :  { %673 = vsyncpa [#allocation9], 1 }
 0x192   :  { %674 = vsyncpa [#allocation12], 1 }
 0x193   :  { %675 = vsyncpa [#allocation4], 1 }
 0x194   :  { %676 = vsyncpa [#allocation15], 1 }

</bundles_post_ra>
